<compile_context>
chip_gen: v5e
topology: v5e:2x2
jax: 0.10.0
libtpu: 0.0.40
codegen_flags: <defaults>
</compile_context>

<pallas_src>
import functools

import jax
import jax.numpy as jnp
from jax.experimental import pallas as pl
from jax.experimental.pallas import tpu as pltpu


def _round_up(x, m):
    return (x + m - 1) // m * m


def _spectral_normalize(w, n_iters=30, seed=0):
    """Divide weight (out, in) by its largest singular value (power iteration).

    Runs only at parameter-setup time, never in the forward path.
    """
    out_dim, _ = w.shape
    u = jax.random.normal(jax.random.PRNGKey(seed), (out_dim,), dtype=jnp.float32)
    u = u / (jnp.linalg.norm(u) + 1e-12)
    w32 = w.astype(jnp.float32)

    def body(_, u):
        v = w32.T @ u
        v = v / (jnp.linalg.norm(v) + 1e-12)
        u = w32 @ v
        u = u / (jnp.linalg.norm(u) + 1e-12)
        return u

    u = jax.lax.fori_loop(0, n_iters, body, u)
    v = w32.T @ u
    v = v / (jnp.linalg.norm(v) + 1e-12)
    sigma = u @ (w32 @ v)
    return (w32 / sigma).astype(w.dtype)


def prepare_encnet_params(w1, w2, compute_dtype=jnp.bfloat16):
    """One-time setup: spectral-normalize, transpose, pad hidden to 128, cast.

    w1: (hid, in_channel), w2: (out_channel, hid) -- PyTorch nn.Linear layout.
    Returns (w1t_padded, w2t_padded) ready for `encnet_forward`.
    """
    # TODO(synk): PyTorch spectral_norm does 1 power iteration per forward from
    # a persistent buffer; here it is converged once at setup time.
    w1n = _spectral_normalize(w1, seed=1)
    w2n = _spectral_normalize(w2, seed=2)
    w1t = w1n.T  # (in_channel, hid)
    w2t = w2n.T  # (hid, out_channel)

    in_c, hid = w1t.shape
    _, out_c = w2t.shape
    hid_p = _round_up(hid, 128)  # lane-dense intermediate feeding the 2nd MXU pass

    w1t_p = jnp.zeros((in_c, hid_p), jnp.float32).at[:, :hid].set(w1t)
    w2t_p = jnp.zeros((hid_p, out_c), jnp.float32).at[:hid, :].set(w2t)
    return w1t_p.astype(compute_dtype), w2t_p.astype(compute_dtype)


def _encnet_kernel(x_ref, w1t_ref, w2t_ref, o_ref):
    # x:   (TB, C_in)      f32 from HBM; cast to bf16 in-register (VPU slack)
    # w1t: (C_in, H_pad)   bf16, VMEM-resident across batch tiles
    # w2t: (H_pad, C_out)  bf16, VMEM-resident across batch tiles
    # o:   (TB, C_out)     f32, narrow (masked) store — tiny writeback stream
    x = x_ref[...].astype(w1t_ref.dtype)
    h = jnp.dot(x, w1t_ref[...], preferred_element_type=jnp.float32)
    h = jnp.maximum(h, 0.0).astype(w2t_ref.dtype)       # ReLU fused with downcast
    y = jnp.dot(h, w2t_ref[...], preferred_element_type=jnp.float32)
    o_ref[...] = jnp.maximum(y, 0.0).astype(o_ref.dtype)


def _choose_tb(B):
    """Batch tile: multiple of 16, >=2 tiles when possible (v7x megacore), cap 1024."""
    b8 = _round_up(B, 8)
    if b8 <= 16:
        return b8
    half = _round_up(pl.cdiv(B, 2), 16)
    return max(16, min(1024, half))


@jax.jit
def encnet_forward(client_enc, w1t_p, w2t_p):
    """client_enc: (B, in_channel) f32. Weights from `prepare_encnet_params`."""
    B, in_c = client_enc.shape
    hid_p, out_c = w2t_p.shape

    TB = _choose_tb(B)
    n_tiles = pl.cdiv(B, TB)

    # 3-deep buffering on the streamed tensors when the grid is long enough to
    # benefit (per-tile compute is tiny, so DMA latency is otherwise exposed).
    if n_tiles >= 3:
        x_spec = pl.BlockSpec((TB, in_c), lambda i: (i, 0),
                              pipeline_mode=pl.Buffered(3))
        o_spec = pl.BlockSpec((TB, out_c), lambda i: (i, 0),
                              pipeline_mode=pl.Buffered(3))
    else:
        x_spec = pl.BlockSpec((TB, in_c), lambda i: (i, 0))
        o_spec = pl.BlockSpec((TB, out_c), lambda i: (i, 0))

    flops = 2 * B * (in_c * hid_p + hid_p * out_c)
    bytes_accessed = (B * in_c * client_enc.dtype.itemsize
                      + w1t_p.size * w1t_p.dtype.itemsize
                      + w2t_p.size * w2t_p.dtype.itemsize
                      + B * out_c * 4)

    out = pl.pallas_call(
        _encnet_kernel,
        out_shape=jax.ShapeDtypeStruct((B, out_c), jnp.float32),
        grid=(n_tiles,),
        in_specs=[
            x_spec,
            pl.BlockSpec(w1t_p.shape, lambda i: (0, 0)),   # resident weights
            pl.BlockSpec(w2t_p.shape, lambda i: (0, 0)),   # resident weights
        ],
        out_specs=o_spec,
        compiler_params=pltpu.CompilerParams(
            dimension_semantics=("parallel",),   # batch tiles across v7x TCs
        ),
        cost_estimate=pl.CostEstimate(
            flops=flops, transcendentals=0, bytes_accessed=bytes_accessed),
    )(client_enc, w1t_p, w2t_p)

    return out


def _torch_style_linear_init(key, out_dim, in_dim):
    # nn.Linear default: kaiming_uniform_(a=sqrt(5)) -> U(-1/sqrt(in), 1/sqrt(in))
    bound = 1.0 / jnp.sqrt(jnp.float32(in_dim))
    return jax.random.uniform(key, (out_dim, in_dim), jnp.float32,
                              minval=-bound, maxval=bound)


def _reference_bf16(x, w1n, w2n):
    """Plain-JAX reference replicating the kernel's bf16-operand / f32-acc math."""
    w1t_bf = w1n.T.astype(jnp.bfloat16)
    w2t_bf = w2n.T.astype(jnp.bfloat16)
    h = jnp.maximum(jnp.dot(x.astype(jnp.bfloat16), w1t_bf,
                            preferred_element_type=jnp.float32), 0.0)
    return jnp.maximum(jnp.dot(h.astype(jnp.bfloat16), w2t_bf,
                               preferred_element_type=jnp.float32), 0.0)


if __name__ == "__main__":
    in_channel, out_channel, hid_dim = 32, 16, 64
    batch = 8

    key = jax.random.PRNGKey(0)
    k_x, k_w1, k_w2, k_xl = jax.random.split(key, 4)

    x = jax.random.normal(k_x, (batch, in_channel), jnp.float32)
    w1 = _torch_style_linear_init(k_w1, hid_dim, in_channel)   # (hid, in)
    w2 = _torch_style_linear_init(k_w2, out_channel, hid_dim)  # (out, hid)

    # One-time parameter setup (spectral norm + transpose + pad + bf16 cast).
    w1t_p, w2t_p = prepare_encnet_params(w1, w2)
    w1n = _spectral_normalize(w1, seed=1)
    w2n = _spectral_normalize(w2, seed=2)

    # --- small batch (single tile) ---
    out = jax.block_until_ready(encnet_forward(x, w1t_p, w2t_p))
    assert out.shape == (batch, out_channel)
    ref = _reference_bf16(x, w1n, w2n)
    assert jnp.allclose(out, ref, atol=1e-3, rtol=1e-3), (
        f"max abs diff {jnp.max(jnp.abs(out - ref))}")
    ref_f32 = jnp.maximum(jnp.maximum(x @ w1n.T, 0.0) @ w2n.T, 0.0)
    assert jnp.allclose(out, ref_f32, atol=5e-2, rtol=5e-2)

    # --- large ragged batch (multi-tile grid, Buffered(3), masked final block) ---
    B_large = 2600
    x_large = jax.random.normal(k_xl, (B_large, in_channel), jnp.float32)
    out_l = jax.block_until_ready(encnet_forward(x_large, w1t_p, w2t_p))
    assert out_l.shape == (B_large, out_channel)
    ref_l = _reference_bf16(x_large, w1n, w2n)
    assert jnp.allclose(out_l, ref_l, atol=1e-3, rtol=1e-3), (
        f"max abs diff {jnp.max(jnp.abs(out_l - ref_l))}")

    print("KERNEL_OK")
</pallas_src>

<mosaic_0001>
module attributes {stable_mosaic.version = 11 : i64} {
  func.func @_encnet_kernel(%arg0: i32, %arg1: memref<8x32xf32, #tpu.memory_space<vmem>>, %arg2: memref<32x128xbf16, #tpu.memory_space<vmem>>, %arg3: memref<128x16xbf16, #tpu.memory_space<vmem>>, %arg4: memref<8x16xf32, #tpu.memory_space<vmem>>) attributes {dimension_semantics = [#tpu.dimension_semantics<parallel>], iteration_bounds = array<i64: 1>, scalar_prefetch = 0 : i64, scratch_operands = 0 : i64, tpu.core_type = #tpu.core_type<tc>, window_params = [{transform_indices = @transform_0, window_bounds = array<i64: 8, 32>}, {pipeline_mode = #tpu.pipeline_mode<synchronous>, transform_indices = @transform_1, window_bounds = array<i64: 32, 128>}, {pipeline_mode = #tpu.pipeline_mode<synchronous>, transform_indices = @transform_2, window_bounds = array<i64: 128, 16>}, {transform_indices = @transform_3, window_bounds = array<i64: 8, 16>}]} {
    %c0 = arith.constant 0 : index
    %c0_0 = arith.constant 0 : index
    %0 = vector.load %arg1[%c0, %c0_0] : memref<8x32xf32, #tpu.memory_space<vmem>>, vector<8x32xf32>
    %1 = arith.truncf %0 : vector<8x32xf32> to vector<8x32xbf16>
    %c0_1 = arith.constant 0 : index
    %c0_2 = arith.constant 0 : index
    %2 = vector.load %arg2[%c0_1, %c0_2] : memref<32x128xbf16, #tpu.memory_space<vmem>>, vector<32x128xbf16>
    %cst = arith.constant dense<0.000000e+00> : vector<8x128xf32>
    %3 = tpu.matmul %1, %2, %cst {dimension_numbers = #tpu.dot_dimension_numbers<[1], [0], [0], [1], [0, 0, 1, 1], [], []>} : vector<8x32xbf16>, vector<32x128xbf16>, vector<8x128xf32> -> vector<8x128xf32>
    %cst_3 = arith.constant 0.000000e+00 : f32
    %4 = vector.broadcast %cst_3 : f32 to vector<8x128xf32>
    %5 = arith.maximumf %3, %4 : vector<8x128xf32>
    %6 = arith.truncf %5 : vector<8x128xf32> to vector<8x128xbf16>
    %c0_4 = arith.constant 0 : index
    %c0_5 = arith.constant 0 : index
    %7 = vector.load %arg3[%c0_4, %c0_5] : memref<128x16xbf16, #tpu.memory_space<vmem>>, vector<128x16xbf16>
    %cst_6 = arith.constant dense<0.000000e+00> : vector<8x16xf32>
    %8 = tpu.matmul %6, %7, %cst_6 {dimension_numbers = #tpu.dot_dimension_numbers<[1], [0], [0], [1], [0, 0, 1, 1], [], []>} : vector<8x128xbf16>, vector<128x16xbf16>, vector<8x16xf32> -> vector<8x16xf32>
    %cst_7 = arith.constant 0.000000e+00 : f32
    %9 = vector.broadcast %cst_7 : f32 to vector<8x16xf32>
    %10 = arith.maximumf %8, %9 : vector<8x16xf32>
    %c0_8 = arith.constant 0 : index
    %c0_9 = arith.constant 0 : index
    %11 = vector.load %arg4[%c0_8, %c0_9] : memref<8x16xf32, #tpu.memory_space<vmem>>, vector<8x16xf32>
    tpu.vector_store %arg4[%c0_8, %c0_9], %10 {strides = array<i32>} : memref<8x16xf32, #tpu.memory_space<vmem>>, vector<8x16xf32>,
    return
  }
  func.func @transform_0(%arg0: i32) -> (i32, i32) {
    %c0_i32 = arith.constant 0 : i32
    %c0_i32_0 = arith.constant 0 : i32
    return %arg0, %c0_i32 : i32, i32
  }
  func.func @transform_1(%arg0: i32) -> (i32, i32) {
    %c0_i32 = arith.constant 0 : i32
    %c0_i32_0 = arith.constant 0 : i32
    %c0_i32_1 = arith.constant 0 : i32
    return %c0_i32, %c0_i32_0 : i32, i32
  }
  func.func @transform_2(%arg0: i32) -> (i32, i32) {
    %c0_i32 = arith.constant 0 : i32
    %c0_i32_0 = arith.constant 0 : i32
    %c0_i32_1 = arith.constant 0 : i32
    return %c0_i32, %c0_i32_0 : i32, i32
  }
  func.func @transform_3(%arg0: i32) -> (i32, i32) {
    %c0_i32 = arith.constant 0 : i32
    %c0_i32_0 = arith.constant 0 : i32
    return %arg0, %c0_i32 : i32, i32
  }
}

</mosaic_0001>

<bundles_post_ra>
// kernel: encnet_forward.1
= control target key start
LH: loop header
LB: loop body
LE: loop exit
PB: predicated region body
PF: predicated region fallthrough
CT: control target
= control target key end

     0   :  { %s284_s0 = inlined_call_operand.vmem [shape: f32[8,32], index: 0, kind: input, shape index: {}]   ;;  %s285_s1 = inlined_call_operand.vmem [shape: bf16[32,128], index: 1, kind: input, shape index: {}]   ;;  %s286_s2 = inlined_call_operand.vmem [shape: bf16[128,16], index: 2, kind: input, shape index: {}]   ;;  %s287_s3 = inlined_call_operand.hbm [shape: f32[8,16], index: 3, kind: output, shape index: {}]  }
   0x1   :  { %v191_v0 = vld [vmem:[%s285_s1 + $0x8] sm:$0xff]  ;;  %v199_v1 = vld [vmem:[%s286_s2 + $0x38] sm:$0xff]  ;;  %v190_v2 = vld [vmem:[%s285_s1] sm:$0xff] }
   0x2   :  { %44 = vmatpush.bf16.msra.mxu0 %v191_v0  ;;  %v16_v3 = vld [vmem:[%s284_s0] sm:$0xff]  ;;  %117 = vmatpush.bf16.msra.mxu1 %v199_v1  ;;  %v198_v4 = vld [vmem:[%s286_s2 + $0x30] sm:$0xff] }
   0x3   :  { %8 = vsyncpa [#allocation3], 0  ;;  %v17_v5 = vpack.c.bf16 %v16_v3, %v16_v3  ;;  %vm34_vm0 = vcmask 261120   ;;  %v197_v6 = vld [vmem:[%s286_s2 + $0x28] sm:$0xff]  ;;  %v196_v7 = vld [vmem:[%s286_s2 + $0x20] sm:$0xff]  ;;  %s227_s5 = smov [#allocation2]  }
   0x4   :  { %v195_v8 = vld [vmem:[%s286_s2 + $0x18] sm:$0xff]  ;;  %v194_v9 = vld [vmem:[%s286_s2 + $0x10] sm:$0xff]  ;;  %v193_v10 = vld [vmem:[%s286_s2 + $0x8] sm:$0xff]  ;;  %s138_s6 = sshll.u32 %s227_s5, 4  ;;  %s140_s9 = sshll.u32 %s287_s3, 4  ;;  %vm131_vm1 = vcmask 130048   ;;  %s139_s6 = int_to_ptr.vmem [resolvable:$true] %s138_s6  ;;  %s141_s9 = int_to_ptr.hbm [resolvable:$true] %s140_s9 }
   0x5   :  { %v192_v11 = vld [vmem:[%s286_s2] sm:$0xff] }
   0x6   :  { %45 = vmatpush.bf16.msra.mxu0 %v190_v2  ;;  %118 = vmatpush.bf16.msra.mxu1 %v198_v4 }
   0x9   :  { %157 = vmatmul.msk.bf16.vlgmr.msra.gmra.mxu0 %vm34_vm0, %v17_v5 }
   0xa   :  { %119 = vmatpush.bf16.msra.mxu1 %v197_v6 }
   0xe   :  { %120 = vmatpush.bf16.msra.mxu1 %v196_v7 }
  0x12   :  { %121 = vmatpush.bf16.msra.mxu1 %v195_v8 }
  0x16   :  { %122 = vmatpush.bf16.msra.mxu1 %v194_v9 }
  0x1a   :  { %123 = vmatpush.bf16.msra.mxu1 %v193_v10 }
  0x1e   :  { %124 = vmatpush.bf16.msra.mxu1 %v192_v11 }
  0x86   :  { %v47_v12 = vpop.f32.mrf.mxu0 }
  0x87   :  { %v51_v13 = vmax.f32 %v47_v12, 0.0 }
  0x89   :  { %v52_v14 = vpack.c.bf16 %v51_v13, %v51_v13 }
  0x8b   :  { %125 = vmatmul.bf16.vlgmr.msra.gmra.mxu1 %v52_v14 }
  0x8e   :  { %v49_v15 = vpop.f32.mrf.mxu0 }
 0x108   :  { %v126_v16 = vpop.f32.mrf.mxu1 }
 0x109   :  { %v130_v17 = vmax.f32 %v126_v16, 0.0 }
 0x10b   :  { %132 = vst.msk [vmem:[#allocation2] sm:$0xff] %vm131_vm1, %v130_v17 }
 0x10c   :  { %143 = dma.vmem_to_hbm [thread:$0]  %s139_s6, 128, %s141_s9, [#allocation3]  }
 0x110   :  { %v128_v18 = vpop.f32.mrf.mxu1 }
 0x111   :  { %225 = dma.done.wait [#allocation3], 128  }
 0x112   :  { %226 = vsyncadd [#allocation3], 4294967168 }
 0x113   :  { %148 = vsyncpa [#allocation3], 1 }

</bundles_post_ra>
